<compile_context>
chip_gen: v5e
topology: v5e:2x2
jax: 0.10.0
libtpu: 0.0.40
codegen_flags: <defaults>
</compile_context>

<pallas_src>
import functools

import jax
import jax.numpy as jnp
from jax.experimental import pallas as pl
from jax.experimental.pallas import tpu as pltpu


def _round_up(x, m):
    return (x + m - 1) // m * m


def _pick_tk(k, preferred=512):
    """Largest multiple of 128 that divides k and is <= preferred.

    k is always a multiple of 128 here, so this terminates at 128."""
    for cand in range(preferred, 0, -128):
        if k % cand == 0:
            return cand
    return k


def _vmem_limit_bytes(est_bytes):
    # Margin over the estimate; floor at the 32 MiB default scoped budget
    # (safe on every generation), cap at 56 MiB to stay inside v7x's 64 MiB
    # physical VMEM.
    return min(max(int(est_bytes * 1.25) + (4 << 20), 32 << 20), 56 << 20)


# ----------------------------------------------------------------------------
# Tiled matmul kernels (K-reduction variant + single-K fast path).
# `a` may be stored narrow (int8 adjacency / bf16 activations); it is upcast to
# bf16 in VMEM so the MXU always runs its native bf16 path.
# ----------------------------------------------------------------------------
def _mm_kernel(a_ref, b_ref, o_ref, acc_ref):
    @pl.when(pl.program_id(1) == 0)
    def _init():
        acc_ref[...] = jnp.zeros_like(acc_ref)

    acc_ref[...] += jnp.dot(a_ref[...].astype(jnp.bfloat16), b_ref[...],
                            preferred_element_type=jnp.float32)

    @pl.when(pl.program_id(1) == pl.num_programs(1) - 1)
    def _store():
        o_ref[...] = acc_ref[...].astype(o_ref.dtype)


def _mm_bias_relu_kernel(a_ref, b_ref, bias_ref, o_ref, acc_ref):
    @pl.when(pl.program_id(1) == 0)
    def _init():
        acc_ref[...] = jnp.zeros_like(acc_ref)

    acc_ref[...] += jnp.dot(a_ref[...].astype(jnp.bfloat16), b_ref[...],
                            preferred_element_type=jnp.float32)

    @pl.when(pl.program_id(1) == pl.num_programs(1) - 1)
    def _store():
        o_ref[...] = jnp.maximum(acc_ref[...] + bias_ref[...], 0.0).astype(o_ref.dtype)


def _mm_simple_kernel(a_ref, b_ref, o_ref):
    o_ref[...] = jnp.dot(a_ref[...].astype(jnp.bfloat16), b_ref[...],
                         preferred_element_type=jnp.float32).astype(o_ref.dtype)


def _mm_bias_relu_simple_kernel(a_ref, b_ref, bias_ref, o_ref):
    acc = jnp.dot(a_ref[...].astype(jnp.bfloat16), b_ref[...],
                  preferred_element_type=jnp.float32)
    o_ref[...] = jnp.maximum(acc + bias_ref[...], 0.0).astype(o_ref.dtype)


def _tiled_matmul(a, b, bias=None, *, tm, tk, out_dtype=jnp.float32):
    """Tiled (M, K) x (K, N) matmul; N kept whole and lane-dense.

    If `bias` (1, N) is given, fuses bias + ReLU in the epilogue.  When the
    reduction fits in a single block the accumulator scratch / pl.when
    scaffolding is skipped entirely."""
    m, k = a.shape
    k2, n = b.shape
    assert k == k2 and m % tm == 0 and k % tk == 0
    kg = k // tk
    out_itemsize = jnp.dtype(out_dtype).itemsize

    # Double-buffered working-set estimate (for the explicit VMEM limit).
    est = (2 * tm * tk * a.dtype.itemsize
           + 2 * tk * n * b.dtype.itemsize
           + 2 * tm * n * out_itemsize
           + (tm * n * 4 if kg > 1 else 0)
           + (2 * n * 4 if bias is not None else 0))

    if kg == 1:
        grid = (m // tm,)
        in_specs = [
            pl.BlockSpec((tm, tk), lambda i: (i, 0)),
            pl.BlockSpec((tk, n), lambda i: (0, 0)),
        ]
        bias_spec = pl.BlockSpec((1, n), lambda i: (0, 0))
        out_spec = pl.BlockSpec((tm, n), lambda i: (i, 0))
        scratch = []
        kernel = _mm_bias_relu_simple_kernel if bias is not None else _mm_simple_kernel
        semantics = ("parallel",)
    else:
        grid = (m // tm, kg)
        in_specs = [
            pl.BlockSpec((tm, tk), lambda i, kk: (i, kk)),
            pl.BlockSpec((tk, n), lambda i, kk: (kk, 0)),
        ]
        bias_spec = pl.BlockSpec((1, n), lambda i, kk: (0, 0))
        out_spec = pl.BlockSpec((tm, n), lambda i, kk: (i, 0))
        scratch = [pltpu.VMEM((tm, n), jnp.float32)]
        kernel = _mm_bias_relu_kernel if bias is not None else _mm_kernel
        semantics = ("parallel", "arbitrary")

    args = [a, b]
    if bias is not None:
        in_specs.append(bias_spec)
        args.append(bias)

    return pl.pallas_call(
        kernel,
        out_shape=jax.ShapeDtypeStruct((m, n), out_dtype),
        grid_spec=pltpu.PrefetchScalarGridSpec(
            num_scalar_prefetch=0,
            grid=grid,
            in_specs=in_specs,
            out_specs=out_spec,
            scratch_shapes=scratch,
        ),
        compiler_params=pltpu.CompilerParams(
            dimension_semantics=semantics,
            vmem_limit_bytes=_vmem_limit_bytes(est),
        ),
    )(*args)


# ----------------------------------------------------------------------------
# Fully fused small-N kernel: both matmuls + bias + ReLU in one pallas_call.
# ----------------------------------------------------------------------------
def _fused_small_kernel(a_ref, x_ref, w_ref, bias_ref, o_ref, *, reassociate):
    a = a_ref[...].astype(jnp.bfloat16)
    if reassociate:
        h = jnp.dot(x_ref[...], w_ref[...], preferred_element_type=jnp.float32)
        agg = jnp.dot(a, h.astype(jnp.bfloat16), preferred_element_type=jnp.float32)
    else:
        ax = jnp.dot(a, x_ref[...], preferred_element_type=jnp.float32)
        agg = jnp.dot(ax.astype(jnp.bfloat16), w_ref[...],
                      preferred_element_type=jnp.float32)
    o_ref[...] = jnp.maximum(agg + bias_ref[...], 0.0).astype(o_ref.dtype)


def _fused_vmem_estimate(n_pad, in_pad, out_pad):
    io = (n_pad * n_pad            # int8 adjacency
          + 2 * n_pad * in_pad     # bf16 x
          + 2 * in_pad * out_pad   # bf16 w
          + 4 * out_pad            # f32 bias
          + 4 * n_pad * out_pad)   # f32 out
    interm = 4 * n_pad * (in_pad + 2 * out_pad)  # f32 temporaries
    return 2 * io + interm


def _fused_small_gcn(adj_i8, x_bf, w_bf, bias, *, reassociate,
                     out_dtype=jnp.float32):
    n_pad = adj_i8.shape[0]
    in_pad = x_bf.shape[1]
    out_pad = w_bf.shape[1]
    kernel = functools.partial(_fused_small_kernel, reassociate=reassociate)
    est = _fused_vmem_estimate(n_pad, in_pad, out_pad)
    return pl.pallas_call(
        kernel,
        out_shape=jax.ShapeDtypeStruct((n_pad, out_pad), out_dtype),
        grid_spec=pltpu.PrefetchScalarGridSpec(
            num_scalar_prefetch=0,
            grid=(1,),
            in_specs=[
                pl.BlockSpec((n_pad, n_pad), lambda i: (0, 0)),
                pl.BlockSpec((n_pad, in_pad), lambda i: (0, 0)),
                pl.BlockSpec((in_pad, out_pad), lambda i: (0, 0)),
                pl.BlockSpec((1, out_pad), lambda i: (0, 0)),
            ],
            out_specs=pl.BlockSpec((n_pad, out_pad), lambda i: (0, 0)),
        ),
        compiler_params=pltpu.CompilerParams(
            dimension_semantics=("arbitrary",),
            vmem_limit_bytes=_vmem_limit_bytes(est),
        ),
    )(adj_i8, x_bf, w_bf, bias)


# ----------------------------------------------------------------------------
# Forward wrapper.
# ----------------------------------------------------------------------------
def gcn_forward(adj, x, w_t, b, *, tile_m=512, tile_k=512):
    """adj: (N, N) f32 dense adjacency (A[i,j]=1 iff edge j->i)
       x:   (N, in_feats) f32 node features
       w_t: (in_feats, out_feats) f32  (transposed nn.Linear weight)
       b:   (1, out_feats) f32         (nn.Linear bias)
       returns relu(adj @ x @ w_t + b), shape (N, out_feats).
       Matmuls run with bf16 operands / f32 accumulation (bf16-level error)."""
    n, in_feats = x.shape
    out_feats = w_t.shape[1]
    reassociate = out_feats <= in_feats

    in_pad = _round_up(in_feats, 128)
    out_pad = _round_up(out_feats, 128)

    small_n = n <= tile_k
    if small_n:
        n_pad = _round_up(n, 128)                 # lane-dense adjacency tiles
    else:
        n_pad = _round_up(n, max(tile_m, tile_k))  # uniform 512 granule

    adj_p = jnp.pad(adj, ((0, n_pad - n), (0, n_pad - n)))
    x_p = jnp.pad(x, ((0, n_pad - n), (0, in_pad - in_feats)))
    w_p = jnp.pad(w_t, ((0, in_pad - in_feats), (0, out_pad - out_feats)))
    b_p = jnp.pad(b, ((0, 0), (0, out_pad - out_feats)))

    # Adjacency entries are exactly 0/1 -> int8 storage is lossless; upcast to
    # bf16 inside the kernels (works on all generations incl. v7x).
    adj_q = adj_p.astype(jnp.int8)
    # Feature operands in bf16: native MXU path + half the DMA bytes.
    x_bf = x_p.astype(jnp.bfloat16)
    w_bf = w_p.astype(jnp.bfloat16)

    if small_n and _fused_vmem_estimate(n_pad, in_pad, out_pad) <= (12 << 20):
        # Single fused kernel: no second launch, no HBM round trip of H.
        out_p = _fused_small_gcn(adj_q, x_bf, w_bf, b_p, reassociate=reassociate)
    else:
        if small_n:
            tm = tk = n_pad
        else:
            tm, tk = tile_m, tile_k
        tk_feat = _pick_tk(in_pad)
        if reassociate:
            # H = X @ W^T (emitted directly in bf16), then relu(A @ H + b).
            h = _tiled_matmul(x_bf, w_bf, tm=tm, tk=tk_feat,
                              out_dtype=jnp.bfloat16)
            out_p = _tiled_matmul(adj_q, h, b_p, tm=tm, tk=tk,
                                  out_dtype=jnp.float32)
        else:
            # agg = A @ X (bf16), then relu(agg @ W^T + b).
            agg = _tiled_matmul(adj_q, x_bf, tm=tm, tk=tk,
                                out_dtype=jnp.bfloat16)
            out_p = _tiled_matmul(agg, w_bf, b_p, tm=tm, tk=tk_feat,
                                  out_dtype=jnp.float32)

    return out_p[:n, :out_feats]


if __name__ == "__main__":
    # Small deterministic problem: N=16 nodes, in_feats=32, out_feats=32.
    N, IN_FEATS, OUT_FEATS = 16, 32, 32

    key = jax.random.PRNGKey(0)
    k_x, k_w, k_b = jax.random.split(key, 3)

    # Node features.
    x = jax.random.normal(k_x, (N, IN_FEATS), dtype=jnp.float32)

    # Deterministic graph: a ring (i -> (i+1) % N) plus self-loops.
    # A[dst, src] = 1 so that A @ X sums incoming-neighbor features.
    src = jnp.arange(N)
    dst = (src + 1) % N
    adj = jnp.zeros((N, N), dtype=jnp.float32)
    adj = adj.at[dst, src].set(1.0)                       # ring edges
    adj = adj.at[jnp.arange(N), jnp.arange(N)].set(1.0)   # self-loops

    # nn.Linear(in_feats, out_feats) parameters (synthetic, deterministic).
    w = jax.random.normal(k_w, (OUT_FEATS, IN_FEATS), dtype=jnp.float32) * 0.1
    b = jax.random.normal(k_b, (OUT_FEATS,), dtype=jnp.float32) * 0.1
    w_t = w.T                                             # (in_feats, out_feats)
    b2d = b.reshape(1, OUT_FEATS)

    out = gcn_forward(adj, x, w_t, b2d)
    jax.block_until_ready(out)

    # Pure-f32 reference of the same semantics.  The kernel intentionally runs
    # the matmuls with bf16 operands (f32 accumulation), so allow bf16-level
    # slack in the comparison.
    ref = jnp.maximum(adj @ x @ w_t + b2d, 0.0)
    assert out.shape == (N, OUT_FEATS)
    max_err = float(jnp.max(jnp.abs(out - ref)))
    assert jnp.allclose(out, ref, atol=3e-2, rtol=2e-2), max_err

    print("KERNEL_OK")
</pallas_src>

<mosaic_0001>
module attributes {stable_mosaic.version = 11 : i64} {
  func.func @_fused_small_kernel(%arg0: i32, %arg1: memref<128x128xi8, #tpu.memory_space<vmem>>, %arg2: memref<128x128xbf16, #tpu.memory_space<vmem>>, %arg3: memref<128x128xbf16, #tpu.memory_space<vmem>>, %arg4: memref<1x128xf32, #tpu.memory_space<vmem>>, %arg5: memref<128x128xf32, #tpu.memory_space<vmem>>) attributes {dimension_semantics = [#tpu.dimension_semantics<arbitrary>], iteration_bounds = array<i64: 1>, scalar_prefetch = 0 : i64, scratch_operands = 0 : i64, tpu.core_type = #tpu.core_type<tc>, window_params = [{pipeline_mode = #tpu.pipeline_mode<synchronous>, transform_indices = @transform_0, window_bounds = array<i64: 128, 128>}, {pipeline_mode = #tpu.pipeline_mode<synchronous>, transform_indices = @transform_1, window_bounds = array<i64: 128, 128>}, {pipeline_mode = #tpu.pipeline_mode<synchronous>, transform_indices = @transform_2, window_bounds = array<i64: 128, 128>}, {pipeline_mode = #tpu.pipeline_mode<synchronous>, transform_indices = @transform_3, window_bounds = array<i64: 1, 128>}, {pipeline_mode = #tpu.pipeline_mode<synchronous>, transform_indices = @transform_4, window_bounds = array<i64: 128, 128>}]} {
    %c0 = arith.constant 0 : index
    %c0_0 = arith.constant 0 : index
    %0 = vector.load %arg1[%c0, %c0_0] : memref<128x128xi8, #tpu.memory_space<vmem>>, vector<128x128xi8>
    %1 = arith.sitofp %0 : vector<128x128xi8> to vector<128x128xbf16>
    %c0_1 = arith.constant 0 : index
    %c0_2 = arith.constant 0 : index
    %2 = vector.load %arg2[%c0_1, %c0_2] : memref<128x128xbf16, #tpu.memory_space<vmem>>, vector<128x128xbf16>
    %c0_3 = arith.constant 0 : index
    %c0_4 = arith.constant 0 : index
    %3 = vector.load %arg3[%c0_3, %c0_4] : memref<128x128xbf16, #tpu.memory_space<vmem>>, vector<128x128xbf16>
    %cst = arith.constant dense<0.000000e+00> : vector<128x128xf32>
    %4 = tpu.matmul %2, %3, %cst {dimension_numbers = #tpu.dot_dimension_numbers<[1], [0], [0], [1], [0, 0, 1, 1], [], []>} : vector<128x128xbf16>, vector<128x128xbf16>, vector<128x128xf32> -> vector<128x128xf32>
    %5 = arith.truncf %4 : vector<128x128xf32> to vector<128x128xbf16>
    %cst_5 = arith.constant dense<0.000000e+00> : vector<128x128xf32>
    %6 = tpu.matmul %1, %5, %cst_5 {dimension_numbers = #tpu.dot_dimension_numbers<[1], [0], [0], [1], [0, 0, 1, 1], [], []>} : vector<128x128xbf16>, vector<128x128xbf16>, vector<128x128xf32> -> vector<128x128xf32>
    %c0_6 = arith.constant 0 : index
    %c0_7 = arith.constant 0 : index
    %7 = vector.load %arg4[%c0_6, %c0_7] : memref<1x128xf32, #tpu.memory_space<vmem>>, vector<1x128xf32>
    %8 = vector.broadcast %7 : vector<1x128xf32> to vector<128x128xf32>
    %9 = arith.addf %6, %8 : vector<128x128xf32>
    %cst_8 = arith.constant 0.000000e+00 : f32
    %10 = vector.broadcast %cst_8 : f32 to vector<128x128xf32>
    %11 = arith.maximumf %9, %10 : vector<128x128xf32>
    %c0_9 = arith.constant 0 : index
    %c0_10 = arith.constant 0 : index
    %12 = vector.load %arg5[%c0_9, %c0_10] : memref<128x128xf32, #tpu.memory_space<vmem>>, vector<128x128xf32>
    tpu.vector_store %arg5[%c0_9, %c0_10], %11 {strides = array<i32>} : memref<128x128xf32, #tpu.memory_space<vmem>>, vector<128x128xf32>,
    return
  }
  func.func @transform_0(%arg0: i32) -> (i32, i32) {
    %c0_i32 = arith.constant 0 : i32
    %c0_i32_0 = arith.constant 0 : i32
    %c0_i32_1 = arith.constant 0 : i32
    return %c0_i32, %c0_i32_0 : i32, i32
  }
  func.func @transform_1(%arg0: i32) -> (i32, i32) {
    %c0_i32 = arith.constant 0 : i32
    %c0_i32_0 = arith.constant 0 : i32
    %c0_i32_1 = arith.constant 0 : i32
    return %c0_i32, %c0_i32_0 : i32, i32
  }
  func.func @transform_2(%arg0: i32) -> (i32, i32) {
    %c0_i32 = arith.constant 0 : i32
    %c0_i32_0 = arith.constant 0 : i32
    %c0_i32_1 = arith.constant 0 : i32
    return %c0_i32, %c0_i32_0 : i32, i32
  }
  func.func @transform_3(%arg0: i32) -> (i32, i32) {
    %c0_i32 = arith.constant 0 : i32
    %c0_i32_0 = arith.constant 0 : i32
    %c0_i32_1 = arith.constant 0 : i32
    return %c0_i32, %c0_i32_0 : i32, i32
  }
  func.func @transform_4(%arg0: i32) -> (i32, i32) {
    %c0_i32 = arith.constant 0 : i32
    %c0_i32_0 = arith.constant 0 : i32
    %c0_i32_1 = arith.constant 0 : i32
    return %c0_i32, %c0_i32_0 : i32, i32
  }
}

</mosaic_0001>

<bundles_post_ra>
// kernel: tpu_custom_call.1
= control target key start
LH: loop header
LB: loop body
LE: loop exit
PB: predicated region body
PF: predicated region fallthrough
CT: control target
= control target key end

     0   :  { %9 = vsyncpa [#allocation3], 0  ;;  %s678_s0 = inlined_call_operand.hbm [shape: s8[128,128], index: 0, kind: input, shape index: {}]   ;;  %s679_s1 = inlined_call_operand.hbm [shape: bf16[128,128], index: 1, kind: input, shape index: {}]   ;;  %s680_s2 = inlined_call_operand.hbm [shape: bf16[128,128], index: 2, kind: input, shape index: {}]   ;;  %s681_s3 = inlined_call_operand.vmem [shape: f32[1,128], index: 3, kind: input, shape index: {}]   ;;  %s682_s4 = inlined_call_operand.hbm [shape: f32[128,128], index: 4, kind: output, shape index: {}]  }
   0x1   :  { %10 = vsyncpa [#allocation6], 0  ;;  %s29_s17 = sshll.u32 %s679_s1, 4  ;;  %s30_s17 = int_to_ptr.hbm [resolvable:$true] %s29_s17 }
   0x2   :  { %11 = vsyncpa [#allocation4], 0  ;;  %s606_s18 = smov [#allocation5]   ;;  %s16_s22 = sshll.u32 %s678_s0, 4  ;;  %s17_s22 = int_to_ptr.hbm [resolvable:$true] %s16_s22 }
   0x3   :  { %s31_s19 = sshll.u32 %s606_s18, 4  ;;  %s607_s23 = smov 64   ;;  %s32_s19 = int_to_ptr.vmem [resolvable:$true] %s31_s19 }
   0x4   :  { %s608_s24 = smov 4   ;;  %s609_s25 = smov [#allocation2]  }
   0x5   :  { %37 = dma.hbm_to_vmem [thread:$0]  %s30_s17, 1024, %s32_s19, [#allocation6], %s607_s23, %s607_s23, %s608_s24  }
   0x6   :  { %s18_s26 = sshll.u32 %s609_s25, 4  ;;  %s610_s27 = smov 128   ;;  %s19_s26 = int_to_ptr.vmem [resolvable:$true] %s18_s26 }
   0x7   :  { %s611_s28 = smov 8   ;;  %s42_s30 = sshll.u32 %s680_s2, 4  ;;  %s43_s30 = int_to_ptr.hbm [resolvable:$true] %s42_s30 }
   0x8   :  { %24 = dma.hbm_to_vmem [thread:$0]  %s17_s22, 512, %s19_s26, [#allocation3], %s610_s27, %s610_s27, %s611_s28  }
   0x9   :  { %s612_s5 = smov [#allocation7]  }
   0xa   :  { %s44_s0 = sshll.u32 %s612_s5, 4  ;;  %s45_s0 = int_to_ptr.vmem [resolvable:$true] %s44_s0 }
   0xb   :  { %50 = dma.hbm_to_vmem [thread:$0]  %s43_s30, 1024, %s45_s0, [#allocation6], %s607_s23, %s607_s23, %s608_s24  }
   0xc   :  { %600 = dma.done.wait [#allocation3], 512  }
   0xd   :  { %601 = vsyncadd [#allocation3], 4294966784 }
   0xe   :  { %602 = dma.done.wait [#allocation6], 2048  }
   0xf   :  { %603 = vsyncadd [#allocation6], 4294965248  ;;  %v478_v0 = vld [vmem:[#allocation7 + $0x38] sm:$0xff]  ;;  %v477_v1 = vld [vmem:[#allocation7 + $0x30] sm:$0xff]  ;;  %s385_s10 = sshll.u32 %s682_s4, 4  ;;  %s386_s10 = int_to_ptr.hbm [resolvable:$true] %s385_s10 }
  0x10   :  { %479 = vmatpush.bf16.msra.mxu2 %v478_v0  ;;  %237 = vmatpush.bf16.msra.mxu0 %v478_v0  ;;  %v476_v2 = vld [vmem:[#allocation7 + $0x28] sm:$0xff]  ;;  %v475_v3 = vld [vmem:[#allocation7 + $0x20] sm:$0xff]  ;;  %v474_v4 = vld [vmem:[#allocation7 + $0x18] sm:$0xff] }
  0x11   :  { %v473_v5 = vld [vmem:[#allocation7 + $0x10] sm:$0xff]  ;;  %v472_v6 = vld [vmem:[#allocation7 + $0x8] sm:$0xff]  ;;  %v471_v7 = vld [vmem:[#allocation7] sm:$0xff] }
  0x12   :  { %v467_v8 = vld [vmem:[#allocation5 + $0x20] sm:$0xff]  ;;  %v468_v10 = vld [vmem:[#allocation5 + $0x28] sm:$0xff]  ;;  %v469_v12 = vld [vmem:[#allocation5 + $0x30] sm:$0xff] }
  0x13   :  { %v463_v9 = vld [vmem:[#allocation5] sm:$0xff]  ;;  %v464_v11 = vld [vmem:[#allocation5 + $0x8] sm:$0xff]  ;;  %v465_v13 = vld [vmem:[#allocation5 + $0x10] sm:$0xff] }
  0x14   :  { %480 = vmatpush.bf16.msra.mxu2 %v477_v1  ;;  %238 = vmatpush.bf16.msra.mxu0 %v477_v1  ;;  %v470_v14 = vld [vmem:[#allocation5 + $0x38] sm:$0xff]  ;;  %v65_v37 = vld [vmem:[#allocation2] sm:$0xff]  ;;  %v67_v38 = vld [vmem:[#allocation2 + $0x10] sm:$0xff] }
  0x15   :  { %v466_v15 = vld [vmem:[#allocation5 + $0x18] sm:$0xff]  ;;  %v69_v40 = vunpack.c.0.s8 %v65_v37  ;;  %v70_v41 = vunpack.c.1.s8 %v65_v37  ;;  %v77_v42 = vunpack.c.0.s8 %v67_v38  ;;  %v78_v43 = vunpack.c.1.s8 %v67_v38  ;;  %v66_v62 = vld [vmem:[#allocation2 + $0x8] sm:$0xff] }
  0x16   :  { %v71_v52 = vunpack.c.2.s8 %v65_v37  ;;  %v72_v53 = vunpack.c.3.s8 %v65_v37  ;;  %v79_v54 = vunpack.c.2.s8 %v67_v38  ;;  %v80_v55 = vunpack.c.3.s8 %v67_v38  ;;  %v68_v63 = vld [vmem:[#allocation2 + $0x18] sm:$0xff] }
  0x17   :  { %v85_v45 = vcvt.s32.f32 %v69_v40  ;;  %v86_v46 = vcvt.s32.f32 %v70_v41  ;;  %v93_v47 = vcvt.s32.f32 %v77_v42  ;;  %v94_v48 = vcvt.s32.f32 %v78_v43 }
  0x18   :  { %481 = vmatpush.bf16.msra.mxu2 %v476_v2  ;;  %239 = vmatpush.bf16.msra.mxu0 %v476_v2  ;;  %v87_v56 = vcvt.s32.f32 %v71_v52  ;;  %v88_v57 = vcvt.s32.f32 %v72_v53  ;;  %v95_v58 = vcvt.s32.f32 %v79_v54  ;;  %v96_v59 = vcvt.s32.f32 %v80_v55 }
  0x19   :  { %v101_v50 = vpack.c.bf16 %v86_v46, %v85_v45  ;;  %v105_v51 = vpack.c.bf16 %v94_v48, %v93_v47  ;;  %v73_v0 = vunpack.c.0.s8 %v66_v62  ;;  %v74_v1 = vunpack.c.1.s8 %v66_v62 }
  0x1a   :  { %v102_v60 = vpack.c.bf16 %v88_v57, %v87_v56  ;;  %v106_v61 = vpack.c.bf16 %v96_v59, %v95_v58  ;;  %v81_v2 = vunpack.c.0.s8 %v68_v63 }
  0x1c   :  { %482 = vmatpush.bf16.msra.mxu2 %v475_v3  ;;  %240 = vmatpush.bf16.msra.mxu0 %v475_v3  ;;  %v82_v3 = vunpack.c.1.s8 %v68_v63 }
  0x20   :  { %483 = vmatpush.bf16.msra.mxu2 %v474_v4  ;;  %241 = vmatpush.bf16.msra.mxu0 %v474_v4  ;;  %v89_v4 = vcvt.s32.f32 %v73_v0 }
  0x24   :  { %484 = vmatpush.bf16.msra.mxu2 %v473_v5  ;;  %242 = vmatpush.bf16.msra.mxu0 %v473_v5  ;;  %v90_v5 = vcvt.s32.f32 %v74_v1 }
  0x28   :  { %485 = vmatpush.bf16.msra.mxu2 %v472_v6  ;;  %243 = vmatpush.bf16.msra.mxu0 %v472_v6  ;;  %v97_v6 = vcvt.s32.f32 %v81_v2 }
  0x2c   :  { %486 = vmatpush.bf16.msra.mxu2 %v471_v7  ;;  %244 = vmatpush.bf16.msra.mxu0 %v471_v7  ;;  %v98_v7 = vcvt.s32.f32 %v82_v3 }
  0x2f   :  { %265 = vmatmul.bf16.vlgmr.msra.gmra.mxu2 %v467_v8  ;;  %245 = vmatmul.bf16.vlgmr.msra.gmra.mxu0 %v463_v9  ;;  %v103_v8 = vpack.c.bf16 %v90_v5, %v89_v4  ;;  %v107_v9 = vpack.c.bf16 %v98_v7, %v97_v6 }
  0x3f   :  { %270 = vmatmul.bf16.gmra.mxu2 %v468_v10  ;;  %250 = vmatmul.bf16.gmra.mxu0 %v464_v11  ;;  %v75_v10 = vunpack.c.2.s8 %v66_v62  ;;  %v76_v11 = vunpack.c.3.s8 %v66_v62 }
  0x4f   :  { %275 = vmatmul.bf16.gmra.mxu2 %v469_v12  ;;  %255 = vmatmul.bf16.gmra.mxu0 %v465_v13  ;;  %v83_v12 = vunpack.c.2.s8 %v68_v63  ;;  %v84_v13 = vunpack.c.3.s8 %v68_v63 }
  0x5f   :  { %280 = vmatmul.bf16.gmra.mxu2 %v470_v14  ;;  %260 = vmatmul.bf16.gmra.mxu0 %v466_v15  ;;  %v91_v14 = vcvt.s32.f32 %v75_v10  ;;  %v92_v15 = vcvt.s32.f32 %v76_v11 }
  0xac   :  { %v246_v17 = vpop.f32.mrf.mxu0 }
  0xb2   :  { %v266_v16 = vpop.f32.mrf.mxu2 }
  0xb4   :  { %v248_v19 = vpop.f32.mrf.mxu0 }
  0xb5   :  { %v286_v49 = vpack.c.bf16 %v248_v19, %v246_v17  ;;  %v100_v17 = vcvt.s32.f32 %v84_v13 }
  0xba   :  { %v268_v18 = vpop.f32.mrf.mxu2 }
  0xbb   :  { %v290_v34 = vpack.c.bf16 %v268_v18, %v266_v16  ;;  %v99_v16 = vcvt.s32.f32 %v83_v12  ;;  %v104_v18 = vpack.c.bf16 %v92_v15, %v91_v14 }
  0xbc   :  { %v251_v21 = vpop.f32.mrf.mxu0 }
  0xbd   :  { %v108_v19 = vpack.c.bf16 %v100_v17, %v99_v16 }
  0xc2   :  { %v271_v20 = vpop.f32.mrf.mxu2 }
  0xc4   :  { %v253_v23 = vpop.f32.mrf.mxu0 }
  0xc5   :  { %v287_v44 = vpack.c.bf16 %v253_v23, %v251_v21 }
  0xca   :  { %v273_v22 = vpop.f32.mrf.mxu2 }
  0xcb   :  { %v291_v33 = vpack.c.bf16 %v273_v22, %v271_v20  ;;  %v654_v20 = vld [vmem:[%s681_s3] ss:$0 sm:$0xff]  ;;  %s613_s3 = smov [#allocation8]  }
  0xcc   :  { %v256_v25 = vpop.f32.mrf.mxu0  ;;  %s383_s7 = sshll.u32 %s613_s3, 4  ;;  %s384_s7 = int_to_ptr.vmem [resolvable:$true] %s383_s7 }
  0xd2   :  { %v276_v24 = vpop.f32.mrf.mxu2 }
  0xd4   :  { %v258_v28 = vpop.f32.mrf.mxu0 }
  0xd5   :  { %v288_v39 = vpack.c.bf16 %v258_v28, %v256_v25 }
  0xda   :  { %v278_v26 = vpop.f32.mrf.mxu2 }
  0xdb   :  { %v292_v32 = vpack.c.bf16 %v278_v26, %v276_v24 }
  0xdc   :  { %v261_v31 = vpop.f32.mrf.mxu0 }
  0xe2   :  { %v281_v27 = vpop.f32.mrf.mxu2 }
  0xe4   :  { %v263_v35 = vpop.f32.mrf.mxu0 }
  0xe5   :  { %v289_v36 = vpack.c.bf16 %v263_v35, %v261_v31 }
  0xea   :  { %v283_v29 = vpop.f32.mrf.mxu2 }
  0xeb   :  { %v293_v30 = vpack.c.bf16 %v283_v29, %v281_v27 }
  0xed   :  { %298 = vmatpush.bf16.msra.mxu1 %v293_v30  ;;  %487 = vmatpush.bf16.msra.mxu3 %v293_v30 }
  0xf1   :  { %299 = vmatpush.bf16.msra.mxu1 %v292_v32  ;;  %488 = vmatpush.bf16.msra.mxu3 %v292_v32 }
  0xf5   :  { %300 = vmatpush.bf16.msra.mxu1 %v291_v33  ;;  %489 = vmatpush.bf16.msra.mxu3 %v291_v33 }
  0xf9   :  { %301 = vmatpush.bf16.msra.mxu1 %v290_v34  ;;  %490 = vmatpush.bf16.msra.mxu3 %v290_v34 }
  0xfd   :  { %302 = vmatpush.bf16.msra.mxu1 %v289_v36  ;;  %491 = vmatpush.bf16.msra.mxu3 %v289_v36 }
 0x101   :  { %303 = vmatpush.bf16.msra.mxu1 %v288_v39  ;;  %492 = vmatpush.bf16.msra.mxu3 %v288_v39 }
 0x105   :  { %304 = vmatpush.bf16.msra.mxu1 %v287_v44  ;;  %493 = vmatpush.bf16.msra.mxu3 %v287_v44 }
 0x109   :  { %305 = vmatpush.bf16.msra.mxu1 %v286_v49  ;;  %494 = vmatpush.bf16.msra.mxu3 %v286_v49 }
 0x10c   :  { %306 = vmatmul.bf16.vlgmr.msra.gmra.mxu1 %v101_v50  ;;  %326 = vmatmul.bf16.vlgmr.msra.gmra.mxu3 %v105_v51 }
 0x11c   :  { %311 = vmatmul.bf16.gmra.mxu1 %v102_v60  ;;  %331 = vmatmul.bf16.gmra.mxu3 %v106_v61 }
 0x12c   :  { %316 = vmatmul.bf16.gmra.mxu1 %v103_v8  ;;  %336 = vmatmul.bf16.gmra.mxu3 %v107_v9 }
 0x13c   :  { %321 = vmatmul.bf16.gmra.mxu1 %v104_v18  ;;  %341 = vmatmul.bf16.gmra.mxu3 %v108_v19 }
 0x189   :  { %v307_v21 = vpop.f32.mrf.mxu1 }
 0x18a   :  { %v308_v22 = vadd.f32 %v654_v20, %v307_v21 }
 0x18c   :  { %v347_v23 = vmax.f32 %v308_v22, 0.0 }
 0x18e   :  { %363 = vst [vmem:[#allocation8] sm:$0xff] %v347_v23 }
 0x18f   :  { %v327_v24 = vpop.f32.mrf.mxu3 }
 0x190   :  { %v328_v25 = vadd.f32 %v654_v20, %v327_v24 }
 0x191   :  { %v309_v26 = vpop.f32.mrf.mxu1 }
 0x192   :  { %v355_v27 = vmax.f32 %v328_v25, 0.0  ;;  %v310_v28 = vadd.f32 %v654_v20, %v309_v26 }
 0x194   :  { %371 = vst [vmem:[#allocation8 + $0x40] sm:$0xff] %v355_v27  ;;  %v348_v29 = vmax.f32 %v310_v28, 0.0 }
 0x196   :  { %364 = vst [vmem:[#allocation8 + $0x8] sm:$0xff] %v348_v29 }
 0x197   :  { %v329_v30 = vpop.f32.mrf.mxu3 }
 0x198   :  { %v330_v31 = vadd.f32 %v654_v20, %v329_v30 }
 0x199   :  { %v312_v32 = vpop.f32.mrf.mxu1 }
 0x19a   :  { %v356_v33 = vmax.f32 %v330_v31, 0.0  ;;  %v313_v34 = vadd.f32 %v654_v20, %v312_v32 }
 0x19c   :  { %372 = vst [vmem:[#allocation8 + $0x48] sm:$0xff] %v356_v33  ;;  %v349_v35 = vmax.f32 %v313_v34, 0.0 }
 0x19e   :  { %365 = vst [vmem:[#allocation8 + $0x10] sm:$0xff] %v349_v35 }
 0x19f   :  { %v332_v36 = vpop.f32.mrf.mxu3 }
 0x1a0   :  { %v333_v37 = vadd.f32 %v654_v20, %v332_v36 }
 0x1a1   :  { %v314_v38 = vpop.f32.mrf.mxu1 }
 0x1a2   :  { %v357_v39 = vmax.f32 %v333_v37, 0.0  ;;  %v315_v40 = vadd.f32 %v654_v20, %v314_v38 }
 0x1a4   :  { %373 = vst [vmem:[#allocation8 + $0x50] sm:$0xff] %v357_v39  ;;  %v350_v41 = vmax.f32 %v315_v40, 0.0 }
 0x1a6   :  { %366 = vst [vmem:[#allocation8 + $0x18] sm:$0xff] %v350_v41 }
 0x1a7   :  { %v334_v42 = vpop.f32.mrf.mxu3 }
 0x1a8   :  { %v335_v43 = vadd.f32 %v654_v20, %v334_v42 }
 0x1a9   :  { %v317_v44 = vpop.f32.mrf.mxu1 }
 0x1aa   :  { %v358_v45 = vmax.f32 %v335_v43, 0.0  ;;  %v318_v46 = vadd.f32 %v654_v20, %v317_v44 }
 0x1ac   :  { %374 = vst [vmem:[#allocation8 + $0x58] sm:$0xff] %v358_v45  ;;  %v351_v47 = vmax.f32 %v318_v46, 0.0 }
 0x1ae   :  { %367 = vst [vmem:[#allocation8 + $0x20] sm:$0xff] %v351_v47 }
 0x1af   :  { %v337_v48 = vpop.f32.mrf.mxu3 }
 0x1b0   :  { %v338_v49 = vadd.f32 %v654_v20, %v337_v48 }
 0x1b1   :  { %v319_v50 = vpop.f32.mrf.mxu1 }
 0x1b2   :  { %v359_v51 = vmax.f32 %v338_v49, 0.0  ;;  %v320_v52 = vadd.f32 %v654_v20, %v319_v50 }
 0x1b4   :  { %375 = vst [vmem:[#allocation8 + $0x60] sm:$0xff] %v359_v51  ;;  %v352_v53 = vmax.f32 %v320_v52, 0.0 }
 0x1b6   :  { %368 = vst [vmem:[#allocation8 + $0x28] sm:$0xff] %v352_v53 }
 0x1b7   :  { %v339_v54 = vpop.f32.mrf.mxu3 }
 0x1b8   :  { %v340_v55 = vadd.f32 %v654_v20, %v339_v54 }
 0x1b9   :  { %v322_v56 = vpop.f32.mrf.mxu1 }
 0x1ba   :  { %v360_v57 = vmax.f32 %v340_v55, 0.0  ;;  %v323_v58 = vadd.f32 %v654_v20, %v322_v56 }
 0x1bc   :  { %376 = vst [vmem:[#allocation8 + $0x68] sm:$0xff] %v360_v57  ;;  %v353_v59 = vmax.f32 %v323_v58, 0.0 }
 0x1be   :  { %369 = vst [vmem:[#allocation8 + $0x30] sm:$0xff] %v353_v59 }
 0x1bf   :  { %v342_v60 = vpop.f32.mrf.mxu3 }
 0x1c0   :  { %v343_v61 = vadd.f32 %v654_v20, %v342_v60 }
 0x1c1   :  { %v324_v62 = vpop.f32.mrf.mxu1 }
 0x1c2   :  { %v361_v63 = vmax.f32 %v343_v61, 0.0  ;;  %v325_v0 = vadd.f32 %v654_v20, %v324_v62 }
 0x1c4   :  { %377 = vst [vmem:[#allocation8 + $0x70] sm:$0xff] %v361_v63  ;;  %v354_v1 = vmax.f32 %v325_v0, 0.0 }
 0x1c6   :  { %370 = vst [vmem:[#allocation8 + $0x38] sm:$0xff] %v354_v1 }
 0x1c7   :  { %v344_v2 = vpop.f32.mrf.mxu3 }
 0x1c8   :  { %v345_v3 = vadd.f32 %v654_v20, %v344_v2 }
 0x1ca   :  { %v362_v4 = vmax.f32 %v345_v3, 0.0 }
 0x1cc   :  { %378 = vst [vmem:[#allocation8 + $0x78] sm:$0xff] %v362_v4 }
 0x1cd   :  { %391 = dma.vmem_to_hbm [thread:$0]  %s384_s7, 2048, %s386_s10, [#allocation4], %s610_s27, %s610_s27, %s611_s28  }
 0x1ce   :  { %604 = dma.done.wait [#allocation4], 2048  }
 0x1cf   :  { %605 = vsyncadd [#allocation4], 4294965248 }
 0x1d0   :  { %396 = vsyncpa [#allocation3], 1 }
 0x1d1   :  { %397 = vsyncpa [#allocation6], 1 }
 0x1d2   :  { %398 = vsyncpa [#allocation4], 1 }

</bundles_post_ra>
